<compile_context>
chip_gen: v7x
topology: tpu7x:2x2x1
jax: 0.10.0
libtpu: 0.0.40
codegen_flags: <defaults>
</compile_context>

<pallas_src>
import functools

import numpy as np
import jax
import jax.numpy as jnp
from jax.experimental import pallas as pl
from jax.experimental.pallas import tpu as pltpu

_MASK_VALUE = float(-np.finfo(np.float32).max)
# 32 MiB scoped VMEM: safe on v5e/v6e (128 MiB physical) and v7x (64 MiB);
# every block below is sized with ample headroom under this limit.
_VMEM_LIMIT = 32 * 1024 * 1024


def _round_up(x, m):
    return ((x + m - 1) // m) * m


def _pick_tile_and_pad(m, cap=2048):
    """Pick the largest lane tile (<= cap) whose padding waste is <= ~25%."""
    mp = _round_up(m, 128)
    for t in (4096, 2048, 1024, 512, 256, 128):
        if t > cap:
            continue
        if _round_up(m, t) <= mp + mp // 4:
            return t, _round_up(m, t)
    return 128, mp


# --------------------------- lane-dense matmul ------------------------------
def _mm_cols_kernel(w_ref, x_ref, b_ref, o_ref):
    acc = jnp.dot(w_ref[...], x_ref[...], preferred_element_type=jnp.float32)
    o_ref[...] = (acc + b_ref[...]).astype(o_ref.dtype)


def matmul_cols(w, x, bias=None, *, out_dtype=jnp.float32, bf16_inputs=True):
    """out (Nout, M) = w (Nout, K) @ x (K, M) + bias.

    Lane-dense along M, M-tiled (large tiles to amortize per-step overhead),
    bf16 MXU inputs with f32 accumulation; output dtype selectable so the
    store (and the consumer's reload) can stay bf16 on mem-bound chains.
    """
    n_out, k = w.shape
    k2, m = x.shape
    assert k == k2
    if bias is None:
        bias = jnp.zeros((n_out,), jnp.float32)
    bias = bias.reshape(n_out, 1).astype(jnp.float32)
    in_dt = jnp.bfloat16 if bf16_inputs else jnp.float32
    tile, mp = _pick_tile_and_pad(m)
    xw = x.astype(in_dt)
    if mp != m:
        xw = jnp.pad(xw, ((0, 0), (0, mp - m)))
    out = pl.pallas_call(
        _mm_cols_kernel,
        out_shape=jax.ShapeDtypeStruct((n_out, mp), out_dtype),
        grid=(mp // tile,),
        in_specs=[
            pl.BlockSpec((n_out, k), lambda i: (0, 0)),
            pl.BlockSpec((k, tile), lambda i: (0, i)),
            pl.BlockSpec((n_out, 1), lambda i: (0, 0)),
        ],
        out_specs=pl.BlockSpec((n_out, tile), lambda i: (0, i)),
        compiler_params=pltpu.CompilerParams(
            dimension_semantics=("parallel",),
            vmem_limit_bytes=_VMEM_LIMIT),
    )(w.astype(in_dt), xw, bias)
    return out[:, :m]


# ------------------------- fused ASA attention ------------------------------
def _attn_kernel(scale, causal, d_c, q_ref, k_ref, v_ref, o_ref):
    # q/k/v: (Gb, d_c, L) bf16 -- lane axis is L (lane-dense), softmax in f32.
    q = q_ref[...].astype(jnp.float32)
    k = k_ref[...].astype(jnp.float32)
    v = v_ref[...].astype(jnp.float32)
    length = q.shape[-1]
    if d_c <= 8:
        # Contraction depth 2..8 would waste the MXU: unrolled VPU MACs instead.
        s = q[:, 0, :, None] * k[:, 0, None, :]
        for c in range(1, d_c):
            s = s + q[:, c, :, None] * k[:, c, None, :]
    else:
        s = jax.lax.dot_general(q, k, (((1,), (1,)), ((0,), (0,))),
                                preferred_element_type=jnp.float32)
    s = s * scale
    if causal:                                            # in-kernel triu(1) mask
        row = jax.lax.broadcasted_iota(jnp.int32, (length, length), 0)
        col = jax.lax.broadcasted_iota(jnp.int32, (length, length), 1)
        s = jnp.where((col > row)[None, :, :], _MASK_VALUE, s)
    s = s - jnp.max(s, axis=-1, keepdims=True)
    p = jnp.exp(s)
    p = p / jnp.sum(p, axis=-1, keepdims=True)            # exact softmax
    if d_c <= 8:
        outs = [jnp.sum(p * v[:, c, None, :], axis=-1)[:, None, :]
                for c in range(d_c)]
        o = jnp.concatenate(outs, axis=1)                 # (Gb, d_c, L)
    else:
        o = jnp.einsum('glm,gcm->gcl', p, v, preferred_element_type=jnp.float32)
    o_ref[...] = o.astype(o_ref.dtype)


def fused_attention(q, k, v, *, causal, scale):
    """softmax(q^T k * scale [+ causal mask]) applied to v; q,k,v: (G, d_c, L).

    Single fused pallas_call (the L x L score never leaves VMEM).  The group
    batch Gb is sized from a ~6 MiB VMEM budget (using lane/sublane-padded
    sizes) and the grid is kept >= 2 steps so megacore can shard it.
    """
    g, d, length = q.shape
    l_pad = _round_up(length, 128)
    d_pad = _round_up(max(d, 1), 16)
    per_group = 2 * l_pad * l_pad * 4 + 8 * d_pad * l_pad  # scores f32 + qkv/o
    gb_budget = max(1, (6 * 1024 * 1024) // per_group)
    nsteps = max(1 if g == 1 else 2, -(-g // gb_budget))
    gb = -(-g // nsteps)
    gp = gb * nsteps
    if gp != g:
        padcfg = ((0, gp - g), (0, 0), (0, 0))
        q = jnp.pad(q, padcfg)
        k = jnp.pad(k, padcfg)
        v = jnp.pad(v, padcfg)
    out = pl.pallas_call(
        functools.partial(_attn_kernel, float(scale), bool(causal), int(d)),
        out_shape=jax.ShapeDtypeStruct((gp, d, length), jnp.bfloat16),
        grid=(nsteps,),
        in_specs=[pl.BlockSpec((gb, d, length), lambda i: (i, 0, 0))] * 3,
        out_specs=pl.BlockSpec((gb, d, length), lambda i: (i, 0, 0)),
        compiler_params=pltpu.CompilerParams(
            dimension_semantics=("parallel",),
            vmem_limit_bytes=_VMEM_LIMIT),
    )(q.astype(jnp.bfloat16), k.astype(jnp.bfloat16), v.astype(jnp.bfloat16))
    return out[:g]


# ------------------------- BatchNorm2d + PReLU ------------------------------
def _bn_stats_kernel(x_ref, sum_ref, sq_ref):
    x = x_ref[...].astype(jnp.float32)                    # (C, tile), f32 accum
    sum_ref[...] = jnp.sum(x, axis=1, keepdims=True)[None]      # (1, C, 1)
    sq_ref[...] = jnp.sum(x * x, axis=1, keepdims=True)[None]


def _bn_apply_kernel(x_ref, scale_ref, shift_ref, alpha_ref, o_ref):
    y = x_ref[...].astype(jnp.float32) * scale_ref[...] + shift_ref[...]
    a = alpha_ref[0]                                       # PReLU alpha (SMEM)
    o_ref[...] = jnp.where(y >= 0.0, y, a * y).astype(o_ref.dtype)


def bn_prelu(x, gamma, beta, alpha, eps=1e-5):
    """BatchNorm2d (training-mode batch statistics) fused with PReLU.

    Channel-major (C, B*F*T) layout, bf16 traffic with f32 in-kernel math.
    Pass 1 emits per-tile partial sum/sumsq with a fully parallel grid (so all
    TensorCores participate); the tiny cross-tile reduce is done in XLA.
    # TODO(synk): PyTorch eval-mode running_mean/var not modelled (batch stats).
    """
    c, b, f, t = x.shape
    m = b * f * t
    xr = x.reshape(c, m).astype(jnp.bfloat16)
    tile, mp = _pick_tile_and_pad(m)
    if mp != m:
        xr = jnp.pad(xr, ((0, 0), (0, mp - m)))
    ntiles = mp // tile
    psum, psq = pl.pallas_call(
        _bn_stats_kernel,
        out_shape=(jax.ShapeDtypeStruct((ntiles, c, 1), jnp.float32),
                   jax.ShapeDtypeStruct((ntiles, c, 1), jnp.float32)),
        grid=(ntiles,),
        in_specs=[pl.BlockSpec((c, tile), lambda i: (0, i))],
        out_specs=(pl.BlockSpec((1, c, 1), lambda i: (i, 0, 0)),
                   pl.BlockSpec((1, c, 1), lambda i: (i, 0, 0))),
        compiler_params=pltpu.CompilerParams(
            dimension_semantics=("parallel",),
            vmem_limit_bytes=_VMEM_LIMIT),
    )(xr)
    count = float(m)                       # true count: zero padding excluded
    mean = jnp.sum(psum, axis=0) / count                   # (C, 1)
    var = jnp.maximum(jnp.sum(psq, axis=0) / count - mean * mean, 0.0)
    scale = gamma.reshape(c, 1).astype(jnp.float32) * jax.lax.rsqrt(var + eps)
    shift = beta.reshape(c, 1).astype(jnp.float32) - mean * scale
    out = pl.pallas_call(
        _bn_apply_kernel,
        out_shape=jax.ShapeDtypeStruct((c, mp), jnp.bfloat16),
        grid=(ntiles,),
        in_specs=[pl.BlockSpec((c, tile), lambda i: (0, i)),
                  pl.BlockSpec((c, 1), lambda i: (0, 0)),
                  pl.BlockSpec((c, 1), lambda i: (0, 0)),
                  pl.BlockSpec(memory_space=pltpu.MemorySpace.SMEM)],
        out_specs=pl.BlockSpec((c, tile), lambda i: (0, i)),
        compiler_params=pltpu.CompilerParams(
            dimension_semantics=("parallel",),
            vmem_limit_bytes=_VMEM_LIMIT),
    )(xr, scale, shift, alpha.reshape(1).astype(jnp.float32))
    return out[:, :m].reshape(c, b, f, t)


# -------------------------------- TMask -------------------------------------
def _tanh_mask_kernel(x_ref, n_ref, o_ref):
    o_ref[...] = jnp.tanh(x_ref[...]) * n_ref[...]


def tanh_mask(x, noisy):
    # TODO(synk): could be fused into the last decoder conv epilogue / istdct
    # input matmul to save one HBM round trip of the output spectrogram.
    shape = x.shape
    n = int(np.prod(shape))
    rows = 8
    ncol = -(-n // rows)
    tile, cp = _pick_tile_and_pad(ncol, cap=4096)
    npad = rows * cp
    xf = jnp.pad(x.reshape(-1).astype(jnp.float32), (0, npad - n)).reshape(rows, cp)
    nf = jnp.pad(noisy.reshape(-1).astype(jnp.float32), (0, npad - n)).reshape(rows, cp)
    out = pl.pallas_call(
        _tanh_mask_kernel,
        out_shape=jax.ShapeDtypeStruct((rows, cp), jnp.float32),
        grid=(cp // tile,),
        in_specs=[pl.BlockSpec((rows, tile), lambda i: (0, i))] * 2,
        out_specs=pl.BlockSpec((rows, tile), lambda i: (0, i)),
        compiler_params=pltpu.CompilerParams(
            dimension_semantics=("parallel",),
            vmem_limit_bytes=_VMEM_LIMIT),
    )(xf, nf)
    return out.reshape(-1)[:n].reshape(shape)


# ------------------------- conv glue (im2col + MXU) --------------------------
def _conv_matmul(xp, wmat, bias, k_f, k_t, s_f, s_t, out_dtype):
    """Valid conv2d on channel-major (C, B, F, T) input as a lane-dense matmul:
    (Cout, C*kF*kT) @ patches (C*kF*kT, B*Fo*To); no transposes needed.

    # TODO(synk): im2col is still host-side XLA (kF*kT x HBM inflation); an
    # in-kernel K-reduction grid axis over kernel taps would read x only once.
    """
    c, b, f, t = xp.shape
    cout = wmat.shape[0]
    fo = (f - k_f) // s_f + 1
    to = (t - k_t) // s_t + 1
    cols = []
    for i in range(k_f):
        for j in range(k_t):
            cols.append(xp[:, :, i:i + s_f * (fo - 1) + 1:s_f,
                           j:j + s_t * (to - 1) + 1:s_t])
    patches = jnp.stack(cols, axis=1)                     # (C, kF*kT, B, Fo, To)
    pmat = patches.reshape(c * k_f * k_t, b * fo * to)    # contiguous reshape
    out = matmul_cols(wmat, pmat, bias, out_dtype=out_dtype)
    return out.reshape(cout, b, fo, to)


def conv1x1(x, wmat, bias, out_dtype=jnp.bfloat16):
    c, b, f, t = x.shape
    cout = wmat.shape[0]
    out = matmul_cols(wmat, x.reshape(c, b * f * t), bias, out_dtype=out_dtype)
    return out.reshape(cout, b, f, t)


def causal_conv2d(x, wmat, bias, k_f, k_t, stride_f):
    # TODO(synk): CausalConv2d source not provided; reconstructed as symmetric
    # freq padding (kF-1)//2 and left-only (causal) time padding kT-1.
    pf = (k_f - 1) // 2
    pt = k_t - 1
    xp = jnp.pad(x.astype(jnp.bfloat16), ((0, 0), (0, 0), (pf, pf), (pt, 0)))
    return _conv_matmul(xp, wmat, bias, k_f, k_t, stride_f, 1, jnp.bfloat16)


def causal_conv_transpose2d(x, w_even_mat, w_odd_mat, bias, k_t, out_dtype):
    # TODO(synk): CausalConvTranspose2d source not provided; reconstructed as
    # ConvTranspose2d(kernel=(4,kT), stride=(2,1)) keeping output rows [0:2F]
    # and the first T (causal) time frames.  Even/odd output-row phase split
    # (two 2-tap convs over one left-padded input) avoids materializing
    # zero-inserted rows -> ~2x fewer MACs and DMA bytes.
    c, b, f, t = x.shape
    xp = jnp.pad(x.astype(jnp.bfloat16),
                 ((0, 0), (0, 0), (1, 0), (k_t - 1, 0)))
    o_even = _conv_matmul(xp, w_even_mat, bias, 2, k_t, 1, 1, out_dtype)
    o_odd = _conv_matmul(xp, w_odd_mat, bias, 2, k_t, 1, 1, out_dtype)
    cout, to = o_even.shape[0], o_even.shape[3]
    return jnp.stack([o_even, o_odd], axis=3).reshape(cout, b, 2 * f, to)


# --------------------------------- ASA ---------------------------------------
def asa(x, p):
    """ASA block on channel-major x (C, B, F, T); q/k/v stay bf16 and the
    fused attention uses a lane-dense (G, d_c, L) layout."""
    c, b, f, t = x.shape
    d_c = c // 8
    scale = 1.0 / float(d_c) ** 0.5

    fqkv = conv1x1(x, p['f_qkv_wmat'], p['f_qkv_b'])      # (3*d_c, B, F, T)
    fqkv = fqkv.reshape(d_c, 3, b, f, t)                  # '(c k)' with k=3
    qf, kf, v = fqkv[:, 0], fqkv[:, 1], fqkv[:, 2]

    # frequency attention: groups (B, T), sequence F (lane-dense)
    qf_g = qf.transpose(1, 3, 0, 2).reshape(b * t, d_c, f)
    kf_g = kf.transpose(1, 3, 0, 2).reshape(b * t, d_c, f)
    v_g = v.transpose(1, 3, 0, 2).reshape(b * t, d_c, f)
    f_out = fused_attention(qf_g, kf_g, v_g, causal=False, scale=scale)

    tqk = conv1x1(x, p['t_qk_wmat'], p['t_qk_b'])         # (2*d_c, B, F, T)
    tqk = tqk.reshape(d_c, 2, b, f, t)
    qt, kt = tqk[:, 0], tqk[:, 1]

    # time attention: groups (B, F), sequence T (lane-dense), causal
    qt_g = qt.transpose(1, 2, 0, 3).reshape(b * f, d_c, t)
    kt_g = kt.transpose(1, 2, 0, 3).reshape(b * f, d_c, t)
    fo_g = f_out.reshape(b, t, d_c, f).transpose(0, 3, 2, 1).reshape(b * f, d_c, t)
    t_out = fused_attention(qt_g, kt_g, fo_g, causal=True, scale=scale)

    t_cm = t_out.reshape(b, f, d_c, t).transpose(2, 0, 1, 3)   # (d_c, B, F, T)
    out = conv1x1(t_cm, p['proj_wmat'], p['proj_b'])
    return out + x


# ------------------------------ STDCT / iSTDCT --------------------------------
def make_dct_matrix(n):
    i = np.arange(n)
    d = np.sqrt(2.0 / n) * np.cos(np.pi * (i[None, :] + 0.5) * i[:, None] / n)
    d[0, :] *= 1.0 / np.sqrt(2.0)
    return jnp.asarray(d, jnp.float32)                    # orthonormal DCT-II


def stdct(x, dct_fwd, n, hop, win):
    # TODO(synk): reference stdct() not provided; reconstructed as centered
    # framing + hann window + orthonormal DCT-II (win_size == N).  Kept f32.
    b, _ = x.shape
    pad = win // 2
    xp = jnp.pad(x, ((0, 0), (pad, pad)))
    t = (xp.shape[1] - win) // hop + 1
    idx = jnp.arange(t)[:, None] * hop + jnp.arange(win)[None, :]
    frames = xp[:, idx]                                   # (B, T, win)
    frames_t = frames.transpose(2, 0, 1).reshape(win, b * t)
    spec_t = matmul_cols(dct_fwd, frames_t, bf16_inputs=False)    # (N, B*T) f32
    return spec_t.reshape(n, b, t).transpose(1, 0, 2)     # (B, N, T)


def istdct(spec, dct_inv, window, n, hop, win, out_len):
    # TODO(synk): reference istdct() not provided; reconstructed as inverse
    # orthonormal DCT + windowed overlap-add with COLA normalization (f32).
    b, _, t = spec.shape
    assert win % hop == 0
    s_t = spec.transpose(1, 0, 2).reshape(n, b * t)
    frames_t = matmul_cols(dct_inv, s_t, bf16_inputs=False)       # (win, B*T)
    frames = frames_t.reshape(win, b, t).transpose(1, 2, 0)       # (B, T, win)
    frames = frames * window[None, None, :]
    r_sub = win // hop
    nblk = t + r_sub - 1
    fr = frames.reshape(b, t, r_sub, hop)
    out = jnp.zeros((b, nblk, hop), jnp.float32)
    for r in range(r_sub):                                # scatter-free OLA
        out = out.at[:, r:r + t, :].add(fr[:, :, r, :])
    out = out.reshape(b, nblk * hop)
    # COLA normalization precomputed on host (input-independent hann window).
    w_np = 0.5 - 0.5 * np.cos(2.0 * np.pi * np.arange(win) / win)
    idx_np = (np.arange(t)[:, None] * hop + np.arange(win)[None, :]).reshape(-1)
    wsum_np = np.zeros(nblk * hop, np.float64)
    np.add.at(wsum_np, idx_np, np.tile(w_np ** 2, t))
    wsum = jnp.asarray(wsum_np, jnp.float32)
    out = out / (wsum[None, :] + 1e-8)
    pad = win // 2
    return out[:, pad:pad + out_len]                      # (B, L)


# ------------------------------ DCTCRN forward --------------------------------
def dctcrn_forward(params, far, mix, n, hop, win):
    far_spec = stdct(far, params['dct_fwd'], n, hop, win)          # (B, N, T)
    mix_spec = stdct(mix, params['dct_fwd'], n, hop, win)
    # channel-major activations (C, B, F, T) everywhere below
    x = jnp.stack([far_spec, mix_spec], axis=0).astype(jnp.bfloat16)

    encoder_out = []
    for lp in params['encoder']:
        x = causal_conv2d(x, lp['conv_wmat'], lp['conv_b'],
                          lp['kF'], lp['kT'], lp['sF'])
        x = asa(x, lp['asa'])
        x = bn_prelu(x, lp['bn_gamma'], lp['bn_beta'], lp['prelu_alpha'])
        encoder_out.append(x)

    c, fd, t, b = x.shape[0], x.shape[2], x.shape[3], x.shape[1]
    xmat = x.transpose(0, 2, 3, 1).reshape(c * fd, t * b)    # rows (c,f), cols (t,b)
    ymat = matmul_cols(params['linear']['w'], xmat, params['linear']['b'],
                       out_dtype=jnp.bfloat16)
    x = ymat.reshape(c, fd, t, b).transpose(0, 3, 1, 2)      # back to (C,B,F,T)

    n_dec = len(params['decoder'])
    for i, lp in enumerate(params['decoder']):
        x = jnp.concatenate([x, encoder_out[-1 - i]], axis=0)
        last = (i == n_dec - 1)
        x = causal_conv_transpose2d(
            x, lp['w_even_mat'], lp['w_odd_mat'], lp['convt_b'], lp['kT'],
            jnp.float32 if last else jnp.bfloat16)
        if 'bn_gamma' in lp:
            x = bn_prelu(x, lp['bn_gamma'], lp['bn_beta'], lp['prelu_alpha'])

    masked = tanh_mask(x, mix_spec[None])                  # TMask ('T'), f32
    spec_out = masked[0]                                   # (B, N, T)
    wav = istdct(spec_out, params['dct_inv'], params['window'],
                 n, hop, win, far.shape[1])
    return wav, spec_out


# ------------------------------- init params ----------------------------------
def init_params(key, n, channels, kernel_size=(5, 2)):
    chans = [2] + list(channels)
    keys = iter(jax.random.split(key, 128))
    k_f, k_t = kernel_size

    def nrm(shape, scale=0.08):
        return scale * jax.random.normal(next(keys), shape, jnp.float32)

    enc = []
    for i in range(len(chans) - 1):
        cin, cout = chans[i], chans[i + 1]
        d_c = cout // 8
        enc.append(dict(
            conv_w=nrm((cout, cin, k_f, k_t)), conv_b=nrm((cout,)),
            asa=dict(
                f_qkv_w=nrm((3 * d_c, cout, 1, 1)), f_qkv_b=nrm((3 * d_c,)),
                t_qk_w=nrm((2 * d_c, cout, 1, 1)), t_qk_b=nrm((2 * d_c,)),
                proj_w=nrm((cout, d_c, 1, 1)), proj_b=nrm((cout,)),
            ),
            bn_gamma=jnp.ones((cout,), jnp.float32),
            bn_beta=jnp.zeros((cout,), jnp.float32),
            prelu_alpha=jnp.full((1,), 0.25, jnp.float32),
        ))

    hidden = n // 2 ** (len(chans) - 1)
    d = hidden * chans[-1]
    lin = dict(w=nrm((d, d)), b=nrm((d,)))

    dec = []
    for idx in range(len(chans) - 1, 0, -1):
        cin = chans[idx] * 2
        cout = chans[idx - 1] if idx != 1 else 1
        layer = dict(convt_w=nrm((cin, cout, 4, k_t)), convt_b=nrm((cout,)))
        if idx != 1:
            layer['bn_gamma'] = jnp.ones((cout,), jnp.float32)
            layer['bn_beta'] = jnp.zeros((cout,), jnp.float32)
            layer['prelu_alpha'] = jnp.full((1,), 0.25, jnp.float32)
        dec.append(layer)

    win = n
    window = (0.5 - 0.5 * jnp.cos(2.0 * jnp.pi * jnp.arange(win) / win))
    return dict(encoder=enc, linear=lin, decoder=dec,
                dct_matrix=make_dct_matrix(n),
                window=window.astype(jnp.float32),
                kernel_size=kernel_size)


def prepare_params(params):
    """Hoist all weight reshapes/flips/splits out of the forward pass; matmul
    weights are stored bf16 except the DCT matrices (kept f32 for accuracy)."""
    k_f, k_t = params['kernel_size']
    enc = []
    for lp in params['encoder']:
        cout = lp['conv_w'].shape[0]
        a = lp['asa']
        enc.append(dict(
            kF=k_f, kT=k_t, sF=(k_f - 1) // 2,
            conv_wmat=lp['conv_w'].reshape(cout, -1).astype(jnp.bfloat16),
            conv_b=lp['conv_b'],
            asa=dict(
                f_qkv_wmat=a['f_qkv_w'].reshape(a['f_qkv_w'].shape[0], -1).astype(jnp.bfloat16),
                f_qkv_b=a['f_qkv_b'],
                t_qk_wmat=a['t_qk_w'].reshape(a['t_qk_w'].shape[0], -1).astype(jnp.bfloat16),
                t_qk_b=a['t_qk_b'],
                proj_wmat=a['proj_w'].reshape(a['proj_w'].shape[0], -1).astype(jnp.bfloat16),
                proj_b=a['proj_b'],
            ),
            bn_gamma=lp['bn_gamma'], bn_beta=lp['bn_beta'],
            prelu_alpha=lp['prelu_alpha'],
        ))

    dec = []
    for lp in params['decoder']:
        w = lp['convt_w']                                     # (Cin, Cout, 4, kT)
        wt = jnp.flip(w, axis=(2, 3)).transpose(1, 0, 2, 3)   # (Cout, Cin, 4, kT)
        cout = wt.shape[0]
        layer = dict(
            kT=k_t,
            # correlation taps over [x[i-1], x[i]] for even/odd output rows
            w_even_mat=wt[:, :, 1::2, :].reshape(cout, -1).astype(jnp.bfloat16),
            w_odd_mat=wt[:, :, 0::2, :].reshape(cout, -1).astype(jnp.bfloat16),
            convt_b=lp['convt_b'],
        )
        if 'bn_gamma' in lp:
            layer['bn_gamma'] = lp['bn_gamma']
            layer['bn_beta'] = lp['bn_beta']
            layer['prelu_alpha'] = lp['prelu_alpha']
        dec.append(layer)

    dct = params['dct_matrix']
    window = params['window']
    return dict(
        encoder=enc,
        linear=dict(w=params['linear']['w'].astype(jnp.bfloat16),
                    b=params['linear']['b']),
        decoder=dec,
        dct_fwd=(dct * window[None, :]).astype(jnp.float32),   # window folded in
        dct_inv=dct.T.astype(jnp.float32),
        window=window,
    )


if __name__ == "__main__":
    # Small config consistent with the module: N=64, hop=16, win=64,
    # channels=[16,32,64] (3 enc/dec stages), batch=2, signal length=128.
    key = jax.random.PRNGKey(0)
    kp, kfar, kmix = jax.random.split(key, 3)
    N, HOP, WIN = 64, 16, 64
    CHANNELS = [16, 32, 64]
    B, L = 2, 128

    raw_params = init_params(kp, N, CHANNELS)
    params = prepare_params(raw_params)
    far = jax.random.normal(kfar, (B, L), jnp.float32)
    mix = jax.random.normal(kmix, (B, L), jnp.float32)

    wav, spec = dctcrn_forward(params, far, mix, N, HOP, WIN)
    jax.block_until_ready((wav, spec))
    assert wav.shape == (B, L)
    assert spec.shape[0] == B and spec.shape[1] == N
    print("KERNEL_OK")
</pallas_src>

<mosaic_0001>
module attributes {stable_mosaic.version = 11 : i64} {
  func.func @_mm_cols_kernel(%arg0: i32, %arg1: memref<64x64xf32, #tpu.memory_space<vmem>>, %arg2: memref<64x128xf32, #tpu.memory_space<vmem>>, %arg3: memref<64x1xf32, #tpu.memory_space<vmem>>, %arg4: memref<64x128xf32, #tpu.memory_space<vmem>>) attributes {dimension_semantics = [#tpu.dimension_semantics<parallel>], iteration_bounds = array<i64: 1>, scalar_prefetch = 0 : i64, scratch_operands = 0 : i64, tpu.core_type = #tpu.core_type<tc>, window_params = [{pipeline_mode = #tpu.pipeline_mode<synchronous>, transform_indices = @transform_0, window_bounds = array<i64: 64, 64>}, {transform_indices = @transform_1, window_bounds = array<i64: 64, 128>}, {pipeline_mode = #tpu.pipeline_mode<synchronous>, transform_indices = @transform_2, window_bounds = array<i64: 64, 1>}, {transform_indices = @transform_3, window_bounds = array<i64: 64, 128>}]} {
    %c0 = arith.constant 0 : index
    %c0_0 = arith.constant 0 : index
    %0 = vector.load %arg1[%c0, %c0_0] : memref<64x64xf32, #tpu.memory_space<vmem>>, vector<64x64xf32>
    %c0_1 = arith.constant 0 : index
    %c0_2 = arith.constant 0 : index
    %1 = vector.load %arg2[%c0_1, %c0_2] : memref<64x128xf32, #tpu.memory_space<vmem>>, vector<64x128xf32>
    %cst = arith.constant dense<0.000000e+00> : vector<64x128xf32>
    %2 = tpu.matmul %0, %1, %cst {dimension_numbers = #tpu.dot_dimension_numbers<[1], [0], [0], [1], [0, 0, 1, 1], [], []>} : vector<64x64xf32>, vector<64x128xf32>, vector<64x128xf32> -> vector<64x128xf32>
    %c0_3 = arith.constant 0 : index
    %c0_4 = arith.constant 0 : index
    %3 = vector.load %arg3[%c0_3, %c0_4] : memref<64x1xf32, #tpu.memory_space<vmem>>, vector<64x1xf32>
    %4 = vector.broadcast %3 : vector<64x1xf32> to vector<64x128xf32>
    %5 = arith.addf %2, %4 : vector<64x128xf32>
    %c0_5 = arith.constant 0 : index
    %c0_6 = arith.constant 0 : index
    %6 = vector.load %arg4[%c0_5, %c0_6] : memref<64x128xf32, #tpu.memory_space<vmem>>, vector<64x128xf32>
    tpu.vector_store %arg4[%c0_5, %c0_6], %5 {strides = array<i32>} : memref<64x128xf32, #tpu.memory_space<vmem>>, vector<64x128xf32>,
    return
  }
  func.func @transform_0(%arg0: i32) -> (i32, i32) {
    %c0_i32 = arith.constant 0 : i32
    %c0_i32_0 = arith.constant 0 : i32
    %c0_i32_1 = arith.constant 0 : i32
    return %c0_i32, %c0_i32_0 : i32, i32
  }
  func.func @transform_1(%arg0: i32) -> (i32, i32) {
    %c0_i32 = arith.constant 0 : i32
    %c0_i32_0 = arith.constant 0 : i32
    return %c0_i32, %arg0 : i32, i32
  }
  func.func @transform_2(%arg0: i32) -> (i32, i32) {
    %c0_i32 = arith.constant 0 : i32
    %c0_i32_0 = arith.constant 0 : i32
    %c0_i32_1 = arith.constant 0 : i32
    return %c0_i32, %c0_i32_0 : i32, i32
  }
  func.func @transform_3(%arg0: i32) -> (i32, i32) {
    %c0_i32 = arith.constant 0 : i32
    %c0_i32_0 = arith.constant 0 : i32
    return %c0_i32, %arg0 : i32, i32
  }
}

</mosaic_0001>

<bundles_post_ra>
// kernel: tpu_custom_call.1
= control target key start
LH: loop header
LB: loop body
LE: loop exit
PB: predicated region body
PF: predicated region fallthrough
CT: control target
= control target key end

     0   :  { %8 = vsyncpa [#allocation3], 0  ;;  %s490_s0 = inlined_call_operand.vmem [shape: f32[64,64], index: 0, kind: input, shape index: {}]   ;;  %s491_s1 = inlined_call_operand.hbm [shape: f32[64,128], index: 1, kind: input, shape index: {}]   ;;  %s492_s2 = inlined_call_operand.vmem [shape: f32[64,1], index: 2, kind: input, shape index: {}]   ;;  %s493_s3 = inlined_call_operand.hbm [shape: f32[64,128], index: 3, kind: output, shape index: {}]  }
   0x1   :  { %9 = vsyncpa [#allocation4], 0  ;;  %s379_s12 = smov [#allocation2]   ;;  %s331_s16 = scalar_lea.hbm %s491_s1, 1024 }
   0x2   :  { %s17_s13 = sshll.u32 %s379_s12, 4  ;;  %p332_p0 = scmp.ne.s32.totalorder %s491_s1, %s331_s16  ;;  %s18_s13 = int_to_ptr.vmem [resolvable:$true] %s17_s13 }
   0x3   :  { %p335_p1 = scmp.lt.u32.totalorder %s331_s16, %s491_s1 }
   0x5   :  { %p337_p2 = pnand %p335_p1, %p332_p0 }
   0x7   :  { %340 = shalt.err (!%p337_p2)
}
   0x8   :  { %s341_s21 = scalar_lea.vmem %s18_s13, 1024  ;;  %p346_p4 = scmp.lt.s32.totalorder %s18_s13, %s18_s13 }
   0x9   :  { %p342_p3 = scmp.ne.s32.totalorder %s18_s13, %s341_s21  ;;  %p347_p5 = scmp.lt.s32.totalorder %s341_s21, %s341_s21 }
   0xb   :  { %p348_p6 = por %p347_p5, %p346_p4 }
   0xd   :  { %p349_p7 = pnand %p348_p6, %p342_p3 }
   0xf   :  { %352 = shalt.err (!%p349_p7)
}
  0x10   :  { %s380_s22 = smov 128   ;;  %s381_s23 = smov 8  }
  0x11   :  { %23 = dma.hbm_to_vmem [thread:$0]  %s491_s1, 1024, %s18_s13, [#allocation3], %s380_s22, %s380_s22, %s381_s23  }
  0x12   :  { %375 = dma.done.wait [#allocation3], 1024  }
  0x13   :  { %376 = vsyncadd [#allocation3], 4294966272  ;;  %v382_v0 = vmov 0   ;;  %v37_v1 = vld [vmem:[#allocation2] sm:$0xff]  ;;  %v38_v2 = vld [vmem:[#allocation2 + $0x8] sm:$0xff]  ;;  %vm93_vm0 = vcmask 523264  }
  0x14   :  { %330 = vset.pattern.permute.xlu1 %v382_v0  ;;  %329 = vset.pattern.permute.xlu0 %v382_v0  ;;  %v39_v3 = vld [vmem:[#allocation2 + $0x10] sm:$0xff]  ;;  %v300_v4 = vpack.c.bf16 %v38_v2, %v37_v1  ;;  %v40_v5 = vld [vmem:[#allocation2 + $0x18] sm:$0xff]  ;;  %v41_v7 = vld [vmem:[#allocation2 + $0x20] sm:$0xff] }
  0x15   :  { %v304_v6 = vpack.c.bf16 %v40_v5, %v39_v3  ;;  %v42_v8 = vld [vmem:[#allocation2 + $0x28] sm:$0xff]  ;;  %v29_v9 = vld [vmem:[%s490_s0] sm:$0xff]  ;;  %v47_v12 = vld [vmem:[%s492_s2 + $0x10] sm:$0xff] }
  0x16   :  { %301 = vmatprep.subr.bf16.mxu0 %v300_v4  ;;  %316 = vmatprep.subr.bf16.mxu1 %v300_v4  ;;  %v33_v10 = vld [vmem:[%s490_s0 + $0x20] sm:$0xff]  ;;  %v308_v11 = vpack.c.bf16 %v42_v8, %v41_v7  ;;  %v43_v14 = vld [vmem:[#allocation2 + $0x30] sm:$0xff]  ;;  %v44_v15 = vld [vmem:[#allocation2 + $0x38] sm:$0xff] }
  0x17   :  { %303 = vmatpush3.bf16.msra.mxu0 %v300_v4  ;;  %320 = vmatpush3.bf16.msra.mxu1 %v300_v4  ;;  %v45_v13 = vld [vmem:[%s492_s2] sm:$0xff]  ;;  %v48_v16 = vld [vmem:[%s492_s2 + $0x18] sm:$0xff]  ;;  %v46_v17 = vld [vmem:[%s492_s2 + $0x8] sm:$0xff]  ;;  %v312_v18 = vpack.c.bf16 %v44_v15, %v43_v14 }
  0x18   :  { %305 = vmatprep.subr.bf16.mxu0 %v304_v6  ;;  %317 = vmatprep.subr.bf16.mxu1 %v304_v6  ;;  %v50_v19 = vld [vmem:[%s492_s2 + $0x28] sm:$0xff]  ;;  %v49_v20 = vld [vmem:[%s492_s2 + $0x20] sm:$0xff]  ;;  %v31_v23 = vld [vmem:[%s490_s0 + $0x10] sm:$0xff] }
  0x19   :  { %288 = vmatprep.mubr.msk.f32.mxu0 %vm93_vm0, %v29_v9  ;;  %294 = vmatprep.mubr.msk.f32.mxu1 %vm93_vm0, %v33_v10  ;;  %v30_v21 = vld [vmem:[%s490_s0 + $0x8] sm:$0xff]  ;;  %v35_v24 = vld [vmem:[%s490_s0 + $0x30] sm:$0xff]  ;;  %v52_v25 = vld [vmem:[%s492_s2 + $0x38] sm:$0xff] }
  0x1a   :  { %65 = vperm.xlu1 %330, %v47_v12   ;;  %55 = vperm.xlu0 %329, %v45_v13   ;;  %v34_v22 = vld [vmem:[%s490_s0 + $0x28] sm:$0xff]  ;;  %v51_v26 = vld [vmem:[%s492_s2 + $0x30] sm:$0xff]  ;;  %v32_v27 = vld [vmem:[%s490_s0 + $0x18] sm:$0xff] }
  0x1b   :  { %307 = vmatpush3.bf16.msra.mxu0 %v304_v6  ;;  %321 = vmatpush3.bf16.msra.mxu1 %v304_v6  ;;  %v36_v28 = vld [vmem:[%s490_s0 + $0x38] sm:$0xff]  ;;  %s383_s0 = smov [#allocation5]  }
  0x1c   :  { %309 = vmatprep.subr.bf16.mxu0 %v308_v11  ;;  %318 = vmatprep.subr.bf16.mxu1 %v308_v11  ;;  %s236_s2 = sshll.u32 %s383_s0, 4  ;;  %s237_s2 = int_to_ptr.vmem [resolvable:$true] %s236_s2 }
  0x1d   :  { %s353_s4 = scalar_lea.vmem %s237_s2, 1024  ;;  %p358_p9 = scmp.lt.s32.totalorder %s237_s2, %s237_s2 }
  0x1e   :  { %70 = vperm.xlu1 %330, %v48_v16   ;;  %60 = vperm.xlu0 %329, %v46_v17   ;;  %p354_p8 = scmp.ne.s32.totalorder %s237_s2, %s353_s4  ;;  %p359_p10 = scmp.lt.s32.totalorder %s353_s4, %s353_s4 }
  0x1f   :  { %311 = vmatpush3.bf16.msra.mxu0 %v308_v11  ;;  %322 = vmatpush3.bf16.msra.mxu1 %v308_v11 }
  0x20   :  { %313 = vmatprep.subr.bf16.mxu0 %v312_v18  ;;  %319 = vmatprep.subr.bf16.mxu1 %v312_v18  ;;  %p360_p11 = por %p359_p10, %p358_p9 }
  0x22   :  { %80 = vperm.xlu1 %330, %v50_v19   ;;  %75 = vperm.xlu0 %329, %v49_v20   ;;  %p361_p12 = pnand %p360_p11, %p354_p8 }
  0x23   :  { %315 = vmatpush3.bf16.msra.mxu0 %v312_v18  ;;  %323 = vmatpush3.bf16.msra.mxu1 %v312_v18 }
  0x26   :  { %289 = vmatmul.mubr.msk.f32.vlgmr.msra.gmra.mrb[0].mxu0 %vm93_vm0, %v30_v21  ;;  %295 = vmatmul.mubr.msk.f32.vlgmr.msra.gmra.mrb[0].mxu1 %vm93_vm0, %v34_v22 }
  0x27   :  { %291 = vmatprep.mubr.msk.f32.mxu0 %vm93_vm0, %v31_v23  ;;  %297 = vmatprep.mubr.msk.f32.mxu1 %vm93_vm0, %v35_v24 }
  0x28   :  { %90 = vperm.xlu1 %330, %v52_v25   ;;  %85 = vperm.xlu0 %329, %v51_v26  }
  0x2a   :  { %292 = vmatmul.mubr.msk.f32.gmra.mrb[2].mxu0 %vm93_vm0, %v32_v27  ;;  %298 = vmatmul.mubr.msk.f32.gmra.mrb[2].mxu1 %vm93_vm0, %v36_v28 }
  0x99   :  { %v66_v29 = vpop.permute.xlu1 %65  ;;  %v56_v30 = vpop.permute.xlu0 %55 }
  0x9d   :  { %v71_v31 = vpop.permute.xlu1 %70  ;;  %v61_v32 = vpop.permute.xlu0 %60 }
  0xa1   :  { %v81_v33 = vpop.permute.xlu1 %80  ;;  %v76_v34 = vpop.permute.xlu0 %75 }
  0xa7   :  { %v91_v43 = vpop.permute.xlu1 %90  ;;  %v86_v44 = vpop.permute.xlu0 %85 }
  0xf9   :  { %v290_v35 = vpop.f32.mrb[0].mxu0  ;;  %v296_v36 = vpop.f32.mrb[0].mxu1 }
  0xfa   :  { %v190_v37 = vadd.f32 %v290_v35, %v61_v32  ;;  %v210_v38 = vadd.f32 %v296_v36, %v81_v33  ;;  %v184_v39 = vpop.f32.mrb[1].mxu0  ;;  %v204_v40 = vpop.f32.mrb[1].mxu1 }
  0xfb   :  { %v185_v41 = vadd.f32 %v184_v39, %v56_v30  ;;  %v205_v42 = vadd.f32 %v204_v40, %v76_v34 }
  0xfc   :  { %224 = vst [vmem:[#allocation5 + $0x8] sm:$0xff] %v190_v37  ;;  %228 = vst [vmem:[#allocation5 + $0x28] sm:$0xff] %v210_v38 }
  0xfd   :  { %223 = vst [vmem:[#allocation5] sm:$0xff] %v185_v41  ;;  %227 = vst [vmem:[#allocation5 + $0x20] sm:$0xff] %v205_v42  ;;  %v293_v45 = vpop.f32.mrb[2].mxu0  ;;  %v299_v46 = vpop.f32.mrb[2].mxu1 }
  0xfe   :  { %v200_v47 = vadd.f32 %v293_v45, %v71_v31  ;;  %v220_v48 = vadd.f32 %v299_v46, %v91_v43  ;;  %v194_v49 = vpop.f32.mrb[3].mxu0  ;;  %v214_v50 = vpop.f32.mrb[3].mxu1 }
  0xff   :  { %v195_v51 = vadd.f32 %v194_v49, %v66_v29  ;;  %v215_v52 = vadd.f32 %v214_v50, %v86_v44 }
 0x100   :  { %226 = vst [vmem:[#allocation5 + $0x18] sm:$0xff] %v200_v47  ;;  %230 = vst [vmem:[#allocation5 + $0x38] sm:$0xff] %v220_v48 }
 0x101   :  { %225 = vst [vmem:[#allocation5 + $0x10] sm:$0xff] %v195_v51  ;;  %229 = vst [vmem:[#allocation5 + $0x30] sm:$0xff] %v215_v52 }
 0x102   :  { %364 = shalt.err (!%p361_p12)
}
 0x103   :  { %s365_s7 = scalar_lea.hbm %s493_s3, 1024 }
 0x104   :  { %p366_p13 = scmp.ne.s32.totalorder %s493_s3, %s365_s7  ;;  %p369_p0 = scmp.lt.u32.totalorder %s365_s7, %s493_s3 }
 0x106   :  { %p371_p1 = pnand %p369_p0, %p366_p13 }
 0x108   :  { %374 = shalt.err (!%p371_p1)
}
 0x109   :  { %242 = dma.vmem_to_hbm [thread:$0]  %s237_s2, 1024, %s493_s3, [#allocation4], %s380_s22, %s380_s22, %s381_s23  }
 0x10a   :  { %377 = dma.done.wait [#allocation4], 1024  }
 0x10b   :  { %378 = vsyncadd [#allocation4], 4294966272 }
 0x10c   :  { %246 = vsyncpa [#allocation3], 1 }
 0x10d   :  { %247 = vsyncpa [#allocation4], 1 }

</bundles_post_ra>
